<compile_context>
chip_gen: v5e
topology: v5e:2x2
jax: 0.10.0
libtpu: 0.0.40
codegen_flags: <defaults>
</compile_context>

<pallas_src>
import functools

import jax
import jax.numpy as jnp
from jax.experimental import pallas as pl
from jax.experimental.pallas import tpu as pltpu


def _focal_weight(one_minus_p, gamma):
    """(1 - p)^gamma, specialized to VPU multiplies for small integer gamma."""
    g = float(gamma)
    if g == 0.0:
        return jnp.ones_like(one_minus_p)
    if g.is_integer() and 1.0 <= g <= 8.0:
        w = one_minus_p
        for _ in range(int(g) - 1):
            w = w * one_minus_p
        return w
    # Non-integer gamma: keep the generic (EUP) pow fallback for exactness.
    return jnp.power(one_minus_p, g)


def _focal_loss_kernel(logits_ref, target_ref, out_ref, *, alpha, gamma):
    """Focal loss for one tile.

    logits_ref: (1, C, TS) input-dtype logits  (classes on sublanes, samples on lanes)
    target_ref: (1, 1, TS) int32 class index per sample
    out_ref   : (1, 1, TS) per-sample focal loss (input dtype)
    """
    x = logits_ref[0].astype(jnp.float32)            # (C, TS)
    t = target_ref[0]                                # (1, TS) int32
    C, TS = x.shape

    # Numerically-stable log-sum-exp over classes (sublane axis).
    m = jnp.max(x, axis=0, keepdims=True)            # (1, TS)
    ez = jnp.exp(x - m)                              # (C, TS)  -- only O(C) transcendental
    denom = jnp.sum(ez, axis=0, keepdims=True)       # (1, TS)

    # Gather the target-class logit: one-hot select + sublane reduce.
    cls = jax.lax.broadcasted_iota(jnp.int32, (C, TS), 0)
    x_t = jnp.sum(jnp.where(cls == t, x, 0.0), axis=0, keepdims=True)   # (1, TS)

    # Per-sample focal term -- everything below is O(TS) work only.
    log_p_t = (x_t - m) - jnp.log(denom)             # log_softmax at target class
    p_t = jnp.exp(log_p_t)                           # softmax at target class
    w = _focal_weight(1.0 - p_t, gamma)              # (1 - p_t)^gamma
    out_ref[0] = ((-alpha) * w * log_p_t).astype(out_ref.dtype)


def _round_up(v, m):
    return (v + m - 1) // m * m


def _choose_tile(S, C, itemsize):
    """Pick the lane tile TS (multiple of 128) and the number of tiles."""
    # Budget ~6 MiB per logits buffer: double-buffered that is ~12 MiB, which
    # fits the 16 MiB default scoped VMEM on v5e and easily fits v6e/v7x.
    bytes_per_lane = C * itemsize + 4 + itemsize     # logits column + target + out
    budget = 6 * 1024 * 1024
    ts_max = max(128, min(4096, (budget // bytes_per_lane) // 128 * 128))
    n_tiles = pl.cdiv(S, ts_max)
    ts = _round_up(pl.cdiv(S, n_tiles), 128)         # minimize padding waste
    return ts, n_tiles


def focal_loss(logits, target, alpha, gamma=2.0, reduction="none"):
    """JAX/Pallas equivalent of focal_loss(input, target, alpha, gamma, reduction).

    logits: (B, C, *) float array (PyTorch BxCx* convention)
    target: (B, *)    integer class indices
    returns: (B, *) for reduction='none', scalar for 'mean'/'sum'
    """
    in_dtype = logits.dtype
    B, C = logits.shape[0], logits.shape[1]
    spatial = logits.shape[2:]
    assert target.shape == (B,) + spatial

    if spatial:
        # (B, C, *) -> (B, C, S): free reshape, classes already second-to-last.
        S = 1
        for d in spatial:
            S *= d
        x3 = logits.reshape(B, C, S)
        t3 = target.reshape(B, 1, S).astype(jnp.int32)
        NB = B
    else:
        # (B, C) -> (1, C, B): tiny transpose so samples land on the lane axis.
        S = B
        x3 = logits.T[None, :, :]
        t3 = target.reshape(1, 1, B).astype(jnp.int32)
        NB = 1

    itemsize = jnp.dtype(in_dtype).itemsize
    TS, n_tiles = _choose_tile(S, C, itemsize)
    S_pad = TS * n_tiles
    if S_pad != S:
        x3 = jnp.pad(x3, ((0, 0), (0, 0), (0, S_pad - S)))
        t3 = jnp.pad(t3, ((0, 0), (0, 0), (0, S_pad - S)))

    out = pl.pallas_call(
        functools.partial(_focal_loss_kernel, alpha=float(alpha),
                          gamma=float(gamma)),
        grid=(NB, n_tiles),
        out_shape=jax.ShapeDtypeStruct((NB, 1, S_pad), in_dtype),
        in_specs=[
            pl.BlockSpec((1, C, TS), lambda b, s: (b, 0, s)),   # native dtype, no upcast
            pl.BlockSpec((1, 1, TS), lambda b, s: (b, 0, s)),   # lane-dense targets
        ],
        out_specs=pl.BlockSpec((1, 1, TS), lambda b, s: (b, 0, s)),  # lane-dense output
        compiler_params=pltpu.CompilerParams(
            dimension_semantics=("parallel", "parallel")),
    )(x3, t3)

    loss2 = out[:, 0, :S]                    # strip lane padding
    if spatial:
        loss = loss2.reshape((B,) + spatial)
    else:
        loss = loss2.reshape((B,))

    if reduction == "none":
        return loss
    elif reduction == "mean":
        return jnp.mean(loss)
    elif reduction == "sum":
        return jnp.sum(loss)
    else:
        raise NotImplementedError(f"Invalid reduction mode: {reduction}")


class FocalLoss:
    """Stateless JAX counterpart of the PyTorch FocalLoss module."""

    def __init__(self, alpha, gamma=2.0, reduction="none", eps=None):
        self.alpha = float(alpha)
        self.gamma = float(gamma)
        self.reduction = reduction
        self.eps = eps  # deprecated upstream; unused

    def __call__(self, logits, target):
        return focal_loss(logits, target, self.alpha, self.gamma,
                          self.reduction)


def _focal_loss_ref(logits, target, alpha, gamma):
    """Pure-JAX reference (mirrors the PyTorch math) for verification."""
    p = jax.nn.softmax(logits, axis=1)
    log_p = jax.nn.log_softmax(logits, axis=1)
    one_hot = jax.nn.one_hot(target, logits.shape[1], axis=1,
                             dtype=logits.dtype)
    focal = -alpha * jnp.power(1.0 - p, gamma) * log_p
    return jnp.sum(one_hot * focal, axis=1)


if __name__ == "__main__":
    key = jax.random.PRNGKey(0)
    alpha, gamma = 0.25, 2.0
    loss_fn = FocalLoss(alpha=alpha, gamma=gamma, reduction="none")

    # Case 1: plain classifier logits (B, C), target (B,)
    k1, k2, k3, k4 = jax.random.split(key, 4)
    x1 = jax.random.normal(k1, (8, 4), dtype=jnp.float32)
    t1 = jax.random.randint(k2, (8,), 0, 4, dtype=jnp.int32)
    out1 = jax.block_until_ready(loss_fn(x1, t1))
    ref1 = _focal_loss_ref(x1, t1, alpha, gamma)
    assert out1.shape == (8,)
    assert jnp.allclose(out1, ref1, atol=1e-5, rtol=1e-5)

    # Case 2: spatial case BxCxHxW, target BxHxW (the general BxCx* path)
    x2 = jax.random.normal(k3, (2, 4, 16, 16), dtype=jnp.float32)
    t2 = jax.random.randint(k4, (2, 16, 16), 0, 4, dtype=jnp.int32)
    out2 = jax.block_until_ready(loss_fn(x2, t2))
    ref2 = _focal_loss_ref(x2, t2, alpha, gamma)
    assert out2.shape == (2, 16, 16)
    assert jnp.allclose(out2, ref2, atol=1e-5, rtol=1e-5)

    # Also exercise the 'mean' reduction glue and a non-integer gamma fallback.
    mean_loss = jax.block_until_ready(
        focal_loss(x2, t2, alpha, gamma, reduction="mean"))
    assert jnp.allclose(mean_loss, jnp.mean(ref2), atol=1e-5, rtol=1e-5)

    out_g = jax.block_until_ready(focal_loss(x1, t1, alpha, 1.5))
    ref_g = _focal_loss_ref(x1, t1, alpha, 1.5)
    assert jnp.allclose(out_g, ref_g, atol=1e-5, rtol=1e-5)

    print("KERNEL_OK")
</pallas_src>

<mosaic_0001>
module attributes {stable_mosaic.version = 11 : i64} {
  func.func @_focal_loss_kernel(%arg0: i32, %arg1: i32, %arg2: memref<1x4x128xf32, #tpu.memory_space<vmem>>, %arg3: memref<1x1x128xi32, #tpu.memory_space<vmem>>, %arg4: memref<1x1x128xf32, #tpu.memory_space<vmem>>) attributes {dimension_semantics = [#tpu.dimension_semantics<parallel>, #tpu.dimension_semantics<parallel>], iteration_bounds = array<i64: 1, 1>, scalar_prefetch = 0 : i64, scratch_operands = 0 : i64, tpu.core_type = #tpu.core_type<tc>, window_params = [{transform_indices = @transform_0, window_bounds = array<i64: 1, 4, 128>}, {transform_indices = @transform_1, window_bounds = array<i64: 1, 1, 128>}, {transform_indices = @transform_2, window_bounds = array<i64: 1, 1, 128>}]} {
    %c0 = arith.constant 0 : index
    %c0_0 = arith.constant 0 : index
    %c0_1 = arith.constant 0 : index
    %0 = vector.load %arg2[%c0, %c0_0, %c0_1] : memref<1x4x128xf32, #tpu.memory_space<vmem>>, vector<1x4x128xf32>
    %1 = vector.shape_cast %0 : vector<1x4x128xf32> to vector<4x128xf32>
    %c0_2 = arith.constant 0 : index
    %c0_3 = arith.constant 0 : index
    %c0_4 = arith.constant 0 : index
    %2 = vector.load %arg3[%c0_2, %c0_3, %c0_4] : memref<1x1x128xi32, #tpu.memory_space<vmem>>, vector<1x1x128xi32>
    %3 = vector.shape_cast %2 : vector<1x1x128xi32> to vector<1x128xi32>
    %cst = arith.constant dense<0xFF800000> : vector<128xf32>
    %4 = vector.multi_reduction <maximumf>, %1, %cst [0] : vector<4x128xf32> to vector<128xf32>
    %5 = vector.shape_cast %4 : vector<128xf32> to vector<1x128xf32>
    %6 = vector.broadcast %5 : vector<1x128xf32> to vector<4x128xf32>
    %7 = arith.subf %1, %6 : vector<4x128xf32>
    %8 = math.exp %7 : vector<4x128xf32>
    %cst_5 = arith.constant dense<0.000000e+00> : vector<128xf32>
    %9 = vector.multi_reduction <add>, %8, %cst_5 [0] : vector<4x128xf32> to vector<128xf32>
    %10 = vector.shape_cast %9 : vector<128xf32> to vector<1x128xf32>
    %11 = tpu.iota {dimensions = array<i32: 0>} : vector<4x128xi32>
    %12 = vector.broadcast %3 : vector<1x128xi32> to vector<4x128xi32>
    %13 = arith.cmpi eq, %11, %12 : vector<4x128xi32>
    %cst_6 = arith.constant 0.000000e+00 : f32
    %14 = vector.broadcast %cst_6 : f32 to vector<4x128xf32>
    %15 = arith.select %13, %1, %14 : vector<4x128xi1>, vector<4x128xf32>
    %cst_7 = arith.constant dense<0.000000e+00> : vector<128xf32>
    %16 = vector.multi_reduction <add>, %15, %cst_7 [0] : vector<4x128xf32> to vector<128xf32>
    %17 = vector.shape_cast %16 : vector<128xf32> to vector<1x128xf32>
    %18 = arith.subf %17, %5 : vector<1x128xf32>
    %19 = math.log %10 : vector<1x128xf32>
    %20 = arith.subf %18, %19 : vector<1x128xf32>
    %21 = math.exp %20 : vector<1x128xf32>
    %cst_8 = arith.constant 1.000000e+00 : f32
    %22 = vector.broadcast %cst_8 : f32 to vector<1x128xf32>
    %23 = arith.subf %22, %21 : vector<1x128xf32>
    %24 = arith.mulf %23, %23 : vector<1x128xf32>
    %cst_9 = arith.constant -2.500000e-01 : f32
    %25 = vector.broadcast %cst_9 : f32 to vector<1x128xf32>
    %26 = arith.mulf %25, %24 : vector<1x128xf32>
    %27 = arith.mulf %26, %20 : vector<1x128xf32>
    %c0_10 = arith.constant 0 : index
    %c0_11 = arith.constant 0 : index
    %c0_12 = arith.constant 0 : index
    %28 = vector.load %arg4[%c0_10, %c0_11, %c0_12] : memref<1x1x128xf32, #tpu.memory_space<vmem>>, vector<1x1x128xf32>
    %29 = vector.shape_cast %28 : vector<1x1x128xf32> to vector<1x128xf32>
    %30 = vector.shape_cast %27 : vector<1x128xf32> to vector<1x1x128xf32>
    tpu.vector_store %arg4[%c0_10, %c0_11, %c0_12], %30 {strides = array<i32>} : memref<1x1x128xf32, #tpu.memory_space<vmem>>, vector<1x1x128xf32>,
    return
  }
  func.func @transform_0(%arg0: i32, %arg1: i32) -> (i32, i32, i32) {
    %c0_i32 = arith.constant 0 : i32
    %c0_i32_0 = arith.constant 0 : i32
    return %arg0, %c0_i32, %arg1 : i32, i32, i32
  }
  func.func @transform_1(%arg0: i32, %arg1: i32) -> (i32, i32, i32) {
    %c0_i32 = arith.constant 0 : i32
    %c0_i32_0 = arith.constant 0 : i32
    return %arg0, %c0_i32, %arg1 : i32, i32, i32
  }
  func.func @transform_2(%arg0: i32, %arg1: i32) -> (i32, i32, i32) {
    %c0_i32 = arith.constant 0 : i32
    %c0_i32_0 = arith.constant 0 : i32
    return %arg0, %c0_i32, %arg1 : i32, i32, i32
  }
}

</mosaic_0001>

<bundles_post_ra>
// kernel: tpu_custom_call.1
= control target key start
LH: loop header
LB: loop body
LE: loop exit
PB: predicated region body
PF: predicated region fallthrough
CT: control target
= control target key end

     0   :  { %7 = vsyncpa [#allocation3], 0  ;;  %s219_s0 = inlined_call_operand.hbm [shape: f32[1,4,128], index: 0, kind: input, shape index: {}]   ;;  %s220_s1 = inlined_call_operand.hbm [shape: s32[1,1,128], index: 1, kind: input, shape index: {}]   ;;  %s221_s2 = inlined_call_operand.hbm [shape: f32[1,1,128], index: 2, kind: output, shape index: {}]  }
   0x1   :  { %8 = vsyncpa [#allocation6], 0 }
   0x2   :  { %9 = vsyncpa [#allocation4], 0  ;;  %s15_s11 = sshll.u32 %s219_s0, 4  ;;  %s189_s12 = smov [#allocation2]   ;;  %s16_s11 = int_to_ptr.hbm [resolvable:$true] %s15_s11 }
   0x3   :  { %s17_s13 = sshll.u32 %s189_s12, 4  ;;  %s26_s16 = sshll.u32 %s220_s1, 4  ;;  %s18_s13 = int_to_ptr.vmem [resolvable:$true] %s17_s13  ;;  %s27_s16 = int_to_ptr.hbm [resolvable:$true] %s26_s16 }
   0x4   :  { %20 = dma.hbm_to_vmem [thread:$0]  %s16_s11, 64, %s18_s13, [#allocation3]  }
   0x5   :  { %s190_s17 = smov [#allocation5]  }
   0x6   :  { %s28_s18 = sshll.u32 %s190_s17, 4  ;;  %s29_s18 = int_to_ptr.vmem [resolvable:$true] %s28_s18 }
   0x7   :  { %31 = dma.hbm_to_vmem [thread:$0]  %s27_s16, 16, %s29_s18, [#allocation6]  }
   0x8   :  { %183 = dma.done.wait [#allocation3], 64  }
   0x9   :  { %184 = vsyncadd [#allocation3], 4294967232 }
   0xa   :  { %185 = dma.done.wait [#allocation6], 16  }
   0xb   :  { %186 = vsyncadd [#allocation6], 4294967280  ;;  %vm42_vm0 = vcmask 1043456   ;;  %v40_v0 = vld [vmem:[#allocation2] sm:$0xf]  ;;  %v60_v3 = vlaneseq  ;;  %s191_s0 = smov [#allocation7]  }
   0xc   :  { %v43_v1 = vsel %vm42_vm0, %v40_v0, -inf  ;;  %v104_v7 = vld [vmem:[#allocation5] ss:$0 sm:$0xff]  ;;  %s88_s1 = sshll.u32 %s191_s0, 4  ;;  %s90_s21 = sshll.u32 %s221_s2, 4  ;;  %s89_s1 = int_to_ptr.vmem [resolvable:$true] %s88_s1  ;;  %s91_s21 = int_to_ptr.hbm [resolvable:$true] %s90_s21 }
   0xd   :  { %v44_v2 = vrot.slane %v43_v1, 4  ;;  %v61_v6 = vshrl.u32 %v60_v3, 7 }
   0xf   :  { %v45_v4 = vmax.f32 %v43_v1, %v44_v2  ;;  %vm63_vm1 = vcmp.eq.s32.totalorder %v61_v6, %v104_v7 }
  0x10   :  { %v64_v11 = vsel %vm63_vm1, %v40_v0, 0.0 }
  0x11   :  { %v46_v5 = vrot.slane %v45_v4, 2  ;;  %v65_v14 = vsel %vm42_vm0, %v64_v11, 0.0 }
  0x12   :  { %v66_v15 = vrot.slane %v65_v14, 4 }
  0x13   :  { %v47_v8 = vmax.f32 %v45_v4, %v46_v5 }
  0x14   :  { %v67_v16 = vadd.f32 %v66_v15, %v65_v14 }
  0x15   :  { %v48_v9 = vrot.slane %v47_v8, 1 }
  0x16   :  { %v68_v20 = vrot.slane %v67_v16, 2 }
  0x17   :  { %v49_v10 = vmax.f32 %v47_v8, %v48_v9 }
  0x18   :  { %v69_v23 = vadd.f32 %v68_v20, %v67_v16 }
  0x19   :  { %v50_v12 = vsub.f32 %v40_v0, %v49_v10 }
  0x1a   :  { %v70_v26 = vrot.slane %v69_v23, 1 }
  0x1b   :  { %v51_v13 = vmul.f32 1.442695, %v50_v12 }
  0x1c   :  { %v71_v28 = vadd.f32 %v70_v26, %v69_v23 }
  0x1d   :  { %105 = vpow2.f32 %v51_v13 }
  0x1e   :  { %v72_v29 = vsub.f32 %v71_v28, %v49_v10 }
  0x23   :  { %v106_v17 = vpop.eup %105 }
  0x24   :  { %v53_v18 = vsel %vm42_vm0, %v106_v17, 0.0 }
  0x25   :  { %v54_v19 = vrot.slane %v53_v18, 4 }
  0x27   :  { %v55_v21 = vadd.f32 %v54_v19, %v53_v18 }
  0x29   :  { %v56_v22 = vrot.slane %v55_v21, 2 }
  0x2b   :  { %v57_v24 = vadd.f32 %v56_v22, %v55_v21 }
  0x2d   :  { %v58_v25 = vrot.slane %v57_v24, 1 }
  0x2f   :  { %v59_v27 = vadd.f32 %v58_v25, %v57_v24 }
  0x31   :  { %107 = vlog2.f32 %v59_v27 }
  0x37   :  { %v108_v30 = vpop.eup %107 }
  0x38   :  { %v74_v31 = vmul.f32 0.6931472, %v108_v30 }
  0x3a   :  { %v75_v32 = vsub.f32 %v72_v29, %v74_v31 }
  0x3c   :  { %v76_v33 = vmul.f32 1.442695, %v75_v32 }
  0x3e   :  { %109 = vpow2.f32 %v76_v33 }
  0x44   :  { %v110_v34 = vpop.eup %109 }
  0x45   :  { %v78_v35 = vsub.f32 1.0, %v110_v34 }
  0x47   :  { %v79_v36 = vmul.f32 %v78_v35, %v78_v35 }
  0x49   :  { %v80_v37 = vmul.f32 -0.25, %v79_v36 }
  0x4b   :  { %v81_v38 = vmul.f32 %v80_v37, %v75_v32 }
  0x4d   :  { %82 = vst [vmem:[#allocation7] sm:$0x1] %v81_v38 }
  0x4e   :  { %93 = dma.vmem_to_hbm [thread:$0]  %s89_s1, 16, %s91_s21, [#allocation4]  }
  0x4f   :  { %187 = dma.done.wait [#allocation4], 16  }
  0x50   :  { %188 = vsyncadd [#allocation4], 4294967280 }
  0x51   :  { %98 = vsyncpa [#allocation3], 1 }
  0x52   :  { %99 = vsyncpa [#allocation6], 1 }
  0x53   :  { %100 = vsyncpa [#allocation4], 1 }

</bundles_post_ra>
